<compile_context>
chip_gen: v5e
topology: v5e:2x2
jax: 0.10.0
libtpu: 0.0.40
codegen_flags: <defaults>
</compile_context>

<pallas_src>
import jax
import jax.numpy as jnp
from jax import lax
from jax.experimental import pallas as pl
from jax.experimental.pallas import tpu as pltpu

_VMEM_LIMIT = 32 * 1024 * 1024  # fits comfortably on v5e/v6e/v7x


# ---------------------------------------------------------------------------
# Stage 1: z = MLP(x)   (row-tiled, weights resident)
# ---------------------------------------------------------------------------
def _make_mlp_kernel(n_layers: int):
    """Ref order: x_tile, (w_i, b_i) * n_layers, z_tile."""

    def kernel(*refs):
        x_ref = refs[0]
        z_ref = refs[-1]
        param_refs = refs[1:-1]

        z = x_ref[...].astype(jnp.float32)
        for i in range(n_layers):
            w = param_refs[2 * i][...].astype(jnp.float32)       # (F_in, F_out)
            b = param_refs[2 * i + 1][...].astype(jnp.float32)   # (1, F_out)
            z = jnp.dot(z, w, preferred_element_type=jnp.float32) + b
            if i < n_layers - 1:
                # torch_geometric MLP default: ReLU between layers, plain last layer
                z = jnp.maximum(z, 0.0)
        z_ref[...] = z.astype(z_ref.dtype)

    return kernel


def _mlp_forward(x, params, row_tile=None):
    n_layers = len(params)
    N, F_in = x.shape
    F_out = params[-1][0].shape[1]

    if row_tile is None:
        row_tile = N if (N <= 512 or N % 8 != 0) else 512

    flat_params = []
    in_specs = [pl.BlockSpec((row_tile, F_in), lambda i: (i, 0))]
    for (w, b) in params:
        flat_params.append(w)
        flat_params.append(b)
        in_specs.append(pl.BlockSpec(w.shape, lambda i: (0, 0)))
        in_specs.append(pl.BlockSpec(b.shape, lambda i: (0, 0)))

    return pl.pallas_call(
        _make_mlp_kernel(n_layers),
        out_shape=jax.ShapeDtypeStruct((N, F_out), jnp.float32),
        grid=(pl.cdiv(N, row_tile),),
        in_specs=in_specs,
        out_specs=pl.BlockSpec((row_tile, F_out), lambda i: (i, 0)),
        compiler_params=pltpu.CompilerParams(
            dimension_semantics=("parallel",),
            vmem_limit_bytes=_VMEM_LIMIT,
        ),
    )(x, *flat_params)


# ---------------------------------------------------------------------------
# Stage 2: out = sigmoid(z @ z.T)   (2-D tiled grid, lane-dense output tiles)
# ---------------------------------------------------------------------------
def _adj_kernel(zi_ref, zj_ref, out_ref):
    zi = zi_ref[...]   # (TM, F)
    zj = zj_ref[...]   # (TN, F)
    # Contract on the last dim of BOTH operands -> no materialized transpose.
    adj = lax.dot_general(
        zi, zj,
        dimension_numbers=(((1,), (1,)), ((), ())),
        preferred_element_type=jnp.float32,
    )
    out_ref[...] = jax.nn.sigmoid(adj).astype(out_ref.dtype)


def _adj_tiles(N):
    # Lane-dense output tile: TN a multiple of 128 (target 512) when N allows,
    # otherwise the full dim (required by the (8,128) BlockSpec rule).
    tn = min(N, 512) if N % 128 == 0 else N
    # TM a multiple of 8 (target 256), otherwise the full dim.
    tm = min(N, 256) if N % 8 == 0 else N
    return tm, tn


def _adj_forward(z, tm=None, tn=None, out_dtype=jnp.float32):
    N, F = z.shape
    d_tm, d_tn = _adj_tiles(N)
    tm = d_tm if tm is None else tm
    tn = d_tn if tn is None else tn

    return pl.pallas_call(
        _adj_kernel,
        out_shape=jax.ShapeDtypeStruct((N, N), out_dtype),
        grid=(pl.cdiv(N, tm), pl.cdiv(N, tn)),
        in_specs=[
            pl.BlockSpec((tm, F), lambda i, j: (i, 0)),
            pl.BlockSpec((tn, F), lambda i, j: (j, 0)),
        ],
        out_specs=pl.BlockSpec((tm, tn), lambda i, j: (i, j)),
        compiler_params=pltpu.CompilerParams(
            dimension_semantics=("parallel", "parallel"),
            vmem_limit_bytes=_VMEM_LIMIT,
        ),
    )(z, z)


# ---------------------------------------------------------------------------
# Public wrapper == Classifier.forward
# ---------------------------------------------------------------------------
def classifier_forward(x, params, *, out_dtype=jnp.float32, tm=None, tn=None):
    """x: (N, F_in) f32.  params: list of (w, b), w: (F_in_i, F_out_i),
    b: (1, F_out_i).  Returns sigmoid(MLP(x) @ MLP(x).T) of shape (N, N).
    Empty `params` corresponds to channel_list=None (Identity MLP)."""
    z = x if len(params) == 0 else _mlp_forward(x, params)
    # out_dtype=jnp.bfloat16 halves HBM writeback on the N^2 stage if the
    # consumer tolerates it; default f32 matches the PyTorch module exactly.
    return _adj_forward(z, tm=tm, tn=tn, out_dtype=out_dtype)


def init_params(key, channel_list):
    """Deterministic synthetic init for the MLP Linear layers."""
    params = []
    for i in range(len(channel_list) - 1):
        f_in, f_out = channel_list[i], channel_list[i + 1]
        key, kw, kb = jax.random.split(key, 3)
        bound = 1.0 / jnp.sqrt(jnp.float32(f_in))
        w = jax.random.uniform(kw, (f_in, f_out), jnp.float32, -bound, bound)
        b = jax.random.uniform(kb, (1, f_out), jnp.float32, -bound, bound)
        params.append((w, b))
    return params


def _reference(x, params):
    z = x
    for i, (w, b) in enumerate(params):
        z = jnp.dot(z, w, precision=lax.Precision.HIGHEST) + b
        if i < len(params) - 1:
            z = jnp.maximum(z, 0.0)
    adj = jnp.dot(z, z.T, precision=lax.Precision.HIGHEST)
    return jax.nn.sigmoid(adj)


if __name__ == "__main__":
    channel_list = [32, 64, 16]   # in -> hidden -> out
    key = jax.random.PRNGKey(0)
    key, kp = jax.random.split(key)
    params = init_params(kp, channel_list)

    # Case 1: tiny node set (single full-array tile path).
    key, kx1 = jax.random.split(key)
    x_small = jax.random.normal(kx1, (8, channel_list[0]), dtype=jnp.float32)
    adj_small = jax.block_until_ready(classifier_forward(x_small, params))
    ref_small = _reference(x_small, params)
    assert adj_small.shape == (8, 8)
    assert jnp.allclose(adj_small, ref_small, atol=2e-5, rtol=2e-5)

    # Case 2: larger node set exercising the 2-D tiled adjacency grid.
    key, kx2 = jax.random.split(key)
    x_big = jax.random.normal(kx2, (256, channel_list[0]), dtype=jnp.float32)
    adj_big = jax.block_until_ready(
        classifier_forward(x_big, params, tm=128, tn=128))  # (2,2) grid
    ref_big = _reference(x_big, params)
    assert adj_big.shape == (256, 256)
    assert jnp.allclose(adj_big, ref_big, atol=2e-5, rtol=2e-5)

    print("KERNEL_OK")
</pallas_src>

<mosaic_0001>
module attributes {stable_mosaic.version = 11 : i64} {
  func.func @kernel(%arg0: i32, %arg1: memref<8x32xf32, #tpu.memory_space<vmem>>, %arg2: memref<32x64xf32, #tpu.memory_space<vmem>>, %arg3: memref<1x64xf32, #tpu.memory_space<vmem>>, %arg4: memref<64x16xf32, #tpu.memory_space<vmem>>, %arg5: memref<1x16xf32, #tpu.memory_space<vmem>>, %arg6: memref<8x16xf32, #tpu.memory_space<vmem>>) attributes {dimension_semantics = [#tpu.dimension_semantics<parallel>], iteration_bounds = array<i64: 1>, scalar_prefetch = 0 : i64, scratch_operands = 0 : i64, tpu.core_type = #tpu.core_type<tc>, window_params = [{transform_indices = @transform_0, window_bounds = array<i64: 8, 32>}, {pipeline_mode = #tpu.pipeline_mode<synchronous>, transform_indices = @transform_1, window_bounds = array<i64: 32, 64>}, {pipeline_mode = #tpu.pipeline_mode<synchronous>, transform_indices = @transform_2, window_bounds = array<i64: 1, 64>}, {pipeline_mode = #tpu.pipeline_mode<synchronous>, transform_indices = @transform_3, window_bounds = array<i64: 64, 16>}, {pipeline_mode = #tpu.pipeline_mode<synchronous>, transform_indices = @transform_4, window_bounds = array<i64: 1, 16>}, {transform_indices = @transform_5, window_bounds = array<i64: 8, 16>}]} {
    %c0 = arith.constant 0 : index
    %c0_0 = arith.constant 0 : index
    %0 = vector.load %arg1[%c0, %c0_0] : memref<8x32xf32, #tpu.memory_space<vmem>>, vector<8x32xf32>
    %c0_1 = arith.constant 0 : index
    %c0_2 = arith.constant 0 : index
    %1 = vector.load %arg2[%c0_1, %c0_2] : memref<32x64xf32, #tpu.memory_space<vmem>>, vector<32x64xf32>
    %c0_3 = arith.constant 0 : index
    %c0_4 = arith.constant 0 : index
    %2 = vector.load %arg3[%c0_3, %c0_4] : memref<1x64xf32, #tpu.memory_space<vmem>>, vector<1x64xf32>
    %cst = arith.constant dense<0.000000e+00> : vector<8x64xf32>
    %3 = tpu.matmul %0, %1, %cst {dimension_numbers = #tpu.dot_dimension_numbers<[1], [0], [0], [1], [0, 0, 1, 1], [], []>} : vector<8x32xf32>, vector<32x64xf32>, vector<8x64xf32> -> vector<8x64xf32>
    %4 = vector.broadcast %2 : vector<1x64xf32> to vector<8x64xf32>
    %5 = arith.addf %3, %4 : vector<8x64xf32>
    %cst_5 = arith.constant 0.000000e+00 : f32
    %6 = vector.broadcast %cst_5 : f32 to vector<8x64xf32>
    %7 = arith.maximumf %5, %6 : vector<8x64xf32>
    %c0_6 = arith.constant 0 : index
    %c0_7 = arith.constant 0 : index
    %8 = vector.load %arg4[%c0_6, %c0_7] : memref<64x16xf32, #tpu.memory_space<vmem>>, vector<64x16xf32>
    %c0_8 = arith.constant 0 : index
    %c0_9 = arith.constant 0 : index
    %9 = vector.load %arg5[%c0_8, %c0_9] : memref<1x16xf32, #tpu.memory_space<vmem>>, vector<1x16xf32>
    %cst_10 = arith.constant dense<0.000000e+00> : vector<8x16xf32>
    %10 = tpu.matmul %7, %8, %cst_10 {dimension_numbers = #tpu.dot_dimension_numbers<[1], [0], [0], [1], [0, 0, 1, 1], [], []>} : vector<8x64xf32>, vector<64x16xf32>, vector<8x16xf32> -> vector<8x16xf32>
    %11 = vector.broadcast %9 : vector<1x16xf32> to vector<8x16xf32>
    %12 = arith.addf %10, %11 : vector<8x16xf32>
    %c0_11 = arith.constant 0 : index
    %c0_12 = arith.constant 0 : index
    %13 = vector.load %arg6[%c0_11, %c0_12] : memref<8x16xf32, #tpu.memory_space<vmem>>, vector<8x16xf32>
    tpu.vector_store %arg6[%c0_11, %c0_12], %12 {strides = array<i32>} : memref<8x16xf32, #tpu.memory_space<vmem>>, vector<8x16xf32>,
    return
  }
  func.func @transform_0(%arg0: i32) -> (i32, i32) {
    %c0_i32 = arith.constant 0 : i32
    %c0_i32_0 = arith.constant 0 : i32
    return %arg0, %c0_i32 : i32, i32
  }
  func.func @transform_1(%arg0: i32) -> (i32, i32) {
    %c0_i32 = arith.constant 0 : i32
    %c0_i32_0 = arith.constant 0 : i32
    %c0_i32_1 = arith.constant 0 : i32
    return %c0_i32, %c0_i32_0 : i32, i32
  }
  func.func @transform_2(%arg0: i32) -> (i32, i32) {
    %c0_i32 = arith.constant 0 : i32
    %c0_i32_0 = arith.constant 0 : i32
    %c0_i32_1 = arith.constant 0 : i32
    return %c0_i32, %c0_i32_0 : i32, i32
  }
  func.func @transform_3(%arg0: i32) -> (i32, i32) {
    %c0_i32 = arith.constant 0 : i32
    %c0_i32_0 = arith.constant 0 : i32
    %c0_i32_1 = arith.constant 0 : i32
    return %c0_i32, %c0_i32_0 : i32, i32
  }
  func.func @transform_4(%arg0: i32) -> (i32, i32) {
    %c0_i32 = arith.constant 0 : i32
    %c0_i32_0 = arith.constant 0 : i32
    %c0_i32_1 = arith.constant 0 : i32
    return %c0_i32, %c0_i32_0 : i32, i32
  }
  func.func @transform_5(%arg0: i32) -> (i32, i32) {
    %c0_i32 = arith.constant 0 : i32
    %c0_i32_0 = arith.constant 0 : i32
    return %arg0, %c0_i32 : i32, i32
  }
}

</mosaic_0001>

<bundles_post_ra>
// kernel: tpu_custom_call.1
= control target key start
LH: loop header
LB: loop body
LE: loop exit
PB: predicated region body
PF: predicated region fallthrough
CT: control target
= control target key end

     0   :  { %s219_s0 = inlined_call_operand.vmem [shape: f32[8,32], index: 0, kind: input, shape index: {}]   ;;  %s220_s1 = inlined_call_operand.vmem [shape: f32[32,64], index: 1, kind: input, shape index: {}]   ;;  %s221_s2 = inlined_call_operand.vmem [shape: f32[1,64], index: 2, kind: input, shape index: {}]   ;;  %s222_s3 = inlined_call_operand.vmem [shape: f32[64,16], index: 3, kind: input, shape index: {}]   ;;  %s223_s4 = inlined_call_operand.vmem [shape: f32[1,16], index: 4, kind: input, shape index: {}]   ;;  %s224_s5 = inlined_call_operand.hbm [shape: f32[8,16], index: 5, kind: output, shape index: {}]  }
   0x1   :  { %v25_v0 = vld [vmem:[%s220_s1 + $0x18] sm:$0xff]  ;;  %v24_v1 = vld [vmem:[%s220_s1 + $0x10] sm:$0xff]  ;;  %v23_v3 = vld [vmem:[%s220_s1 + $0x8] sm:$0xff] }
   0x2   :  { %46 = vmatpush.msra.mxu0 %v25_v0  ;;  %v62_v2 = vld [vmem:[%s222_s3 + $0x38] sm:$0xff]  ;;  %v61_v4 = vld [vmem:[%s222_s3 + $0x30] sm:$0xff]  ;;  %v60_v5 = vld [vmem:[%s222_s3 + $0x28] sm:$0xff] }
   0x3   :  { %79 = vmatpush.msra.mxu1 %v62_v2  ;;  %v22_v6 = vld [vmem:[%s220_s1] sm:$0xff] }
   0x4   :  { %47 = vmatpush.msra.mxu0 %v24_v1 }
   0x5   :  { %80 = vmatpush.msra.mxu1 %v61_v4 }
   0x6   :  { %10 = vsyncpa [#allocation3], 0  ;;  %48 = vmatpush.msra.mxu0 %v23_v3  ;;  %v21_v7 = vld [vmem:[%s219_s0] sm:$0xff]  ;;  %vm30_vm0 = vcmask 261120   ;;  %v58_v9 = vld [vmem:[%s222_s3 + $0x18] sm:$0xff]  ;;  %vm67_vm1 = vcmask 523264  }
   0x7   :  { %v59_v8 = vld [vmem:[%s222_s3 + $0x20] sm:$0xff]  ;;  %81 = vmatpush.msra.mxu1 %v60_v5  ;;  %v57_v10 = vld [vmem:[%s222_s3 + $0x10] sm:$0xff]  ;;  %v56_v11 = vld [vmem:[%s222_s3 + $0x8] sm:$0xff]  ;;  %s140_s21 = smov [#allocation2]   ;;  %vm91_vm2 = vcmask 130048  }
   0x8   :  { %49 = vmatpush.msra.mxu0 %v22_v6  ;;  %v55_v12 = vld [vmem:[%s222_s3] sm:$0xff]  ;;  %s98_s22 = sshll.u32 %s140_s21, 4  ;;  %s100_s3 = sshll.u32 %s224_s5, 4  ;;  %s99_s22 = int_to_ptr.vmem [resolvable:$true] %s98_s22  ;;  %s101_s3 = int_to_ptr.hbm [resolvable:$true] %s100_s3 }
   0x9   :  { %109 = vmatmul.msk.f32.vlgmr.msra.gmra.mxu0 %vm30_vm0, %v21_v7  ;;  %82 = vmatpush.msra.mxu1 %v59_v8  ;;  %v112_v13 = vld [vmem:[%s221_s2] ss:$0 sm:$0xff] }
   0xa   :  { %v113_v17 = vld [vmem:[%s223_s4] ss:$0 sm:$0xff] }
   0xb   :  { %83 = vmatpush.msra.mxu1 %v58_v9 }
   0xd   :  { %84 = vmatpush.msra.mxu1 %v57_v10 }
   0xf   :  { %85 = vmatpush.msra.mxu1 %v56_v11 }
  0x11   :  { %86 = vmatpush.msra.mxu1 %v55_v12 }
  0x86   :  { %v51_v14 = vpop.f32.mrf.mxu0 }
  0x87   :  { %v52_v15 = vadd.f32 %v112_v13, %v51_v14 }
  0x89   :  { %v54_v16 = vmax.f32 %v52_v15, 0.0 }
  0x8b   :  { %110 = vmatmul.msk.f32.vlgmr.msra.gmra.mxu1 %vm67_vm1, %v54_v16 }
 0x108   :  { %v88_v18 = vpop.f32.mrf.mxu1 }
 0x109   :  { %v89_v19 = vadd.f32 %v113_v17, %v88_v18 }
 0x10b   :  { %92 = vst.msk [vmem:[#allocation2] sm:$0xff] %vm91_vm2, %v89_v19 }
 0x10c   :  { %103 = dma.vmem_to_hbm [thread:$0]  %s99_s22, 128, %s101_s3, [#allocation3]  }
 0x10d   :  { %138 = dma.done.wait [#allocation3], 128  }
 0x10e   :  { %139 = vsyncadd [#allocation3], 4294967168 }
 0x10f   :  { %108 = vsyncpa [#allocation3], 1 }

</bundles_post_ra>
